<compile_context>
chip_gen: v7x
topology: tpu7x:2x2x1
jax: 0.10.0
libtpu: 0.0.40
codegen_flags: <defaults>
</compile_context>

<pallas_src>
import functools

import jax
import jax.numpy as jnp
from jax.experimental import pallas as pl
from jax.experimental.pallas import tpu as pltpu


def weight_kernel(x1_ref, x2_ref, w_ref, o_ref, *, eps):
    # Fused projection of the difference: one MXU matmul, no bias.
    diff = x1_ref[...] - x2_ref[...]                        # (TN, F)     VPU
    proj = jnp.dot(diff, w_ref[...],
                   preferred_element_type=jnp.float32)      # (TN, FOUT)  MXU
    # Squared L2 norm per row (sqrt dropped since the collate squares it again).
    sq = jnp.sum(proj * proj, axis=1, keepdims=True)        # (TN, 1)     VPU+XLU
    # Lane-dense row first (one small XLU transpose), then exp on dense vregs.
    sq_row = sq.T                                           # (1, TN)     XLU
    o_ref[...] = jnp.exp(-sq_row) + eps                     # EUP + VPU, unmasked vst


def weight_forward(x1, x2, w_t, *, eps=1e-9, tn=None):
    """x1, x2: (N, F) float32; w_t: (F, FOUT) (transposed nn.Linear weight).

    Returns (N,) float32 = exp(-||(x1 @ W^T + b) - (x2 @ W^T + b)||^2) + eps.
    (Bias cancels mathematically and is therefore not an input.)
    If `tn` is given explicitly and N > tn, it must be a multiple of 128.
    """
    N, F = x1.shape
    FOUT = w_t.shape[1]

    if tn is None:
        # ~2 MiB per input tile; multiple of 128 (lane-dense output blocks);
        # clamped so 2 inputs x 2 pipeline buffers stay well inside VMEM.
        target_rows = (2 * 1024 * 1024) // (4 * max(F, 1))
        tn = int(max(128, min(4096, (target_rows // 128) * 128)))
    if N <= tn:
        # Single block equal to the full array dims: no (8,128) divisibility
        # requirement, no padding, no partial blocks.
        tn = N

    grid = (pl.cdiv(N, tn),)

    out = pl.pallas_call(
        functools.partial(weight_kernel, eps=eps),
        out_shape=jax.ShapeDtypeStruct((1, N), jnp.float32),
        grid_spec=pl.GridSpec(
            grid=grid,
            in_specs=[
                pl.BlockSpec((tn, F), lambda i: (i, 0)),      # x1 row tile (pipelined)
                pl.BlockSpec((tn, F), lambda i: (i, 0)),      # x2 row tile (pipelined)
                pl.BlockSpec((F, FOUT), lambda i: (0, 0)),    # weight, VMEM-resident
            ],
            out_specs=pl.BlockSpec((1, tn), lambda i: (0, i)),  # lane-dense output row
        ),
        compiler_params=pltpu.CompilerParams(
            # Row tiles are independent: lets v7x shard them across its 2 TensorCores;
            # neutral on single-TC v5e/v6e.
            dimension_semantics=("parallel",),
            vmem_limit_bytes=48 * 1024 * 1024,
        ),
    )(x1, x2, w_t)

    return out.reshape(N)


def _reference(x1, x2, w, b, eps=1e-9):
    # Full original module math (with bias and the sqrt) to verify the fusions.
    f1 = x1 @ w.T + b
    f2 = x2 @ w.T + b
    dist = jnp.sqrt(jnp.sum((f1 - f2) ** 2, axis=1))
    return jnp.exp(-dist ** 2) + eps


if __name__ == "__main__":
    key = jax.random.PRNGKey(0)
    k1, k2, kw, kb, k3, k4 = jax.random.split(key, 6)

    FIN = 32
    FOUT = FIN  # Weight.__init__ default: fout = fin when no kwargs given

    # Deterministic nn.Linear-style init: U(-1/sqrt(fin), 1/sqrt(fin)), torch layout.
    bound = 1.0 / (FIN ** 0.5)
    w = jax.random.uniform(kw, (FOUT, FIN), minval=-bound, maxval=bound,
                           dtype=jnp.float32)
    b = jax.random.uniform(kb, (FOUT,), minval=-bound, maxval=bound,
                           dtype=jnp.float32)
    w_t = w.T  # (FIN, FOUT) so the kernel computes diff @ W^T directly

    # Case 1: spec-sized inputs (N=8) -- single full block, no tiling path.
    N1 = 8
    x1 = jax.random.normal(k1, (N1, FIN), dtype=jnp.float32)
    x2 = x1 + 0.2 * jax.random.normal(k2, (N1, FIN), dtype=jnp.float32)
    out1 = weight_forward(x1, x2, w_t)
    jax.block_until_ready(out1)
    ref1 = _reference(x1, x2, w, b)
    assert out1.shape == (N1,)
    assert jnp.allclose(out1, ref1, rtol=1e-4, atol=1e-6)

    # Case 2: tiled path with a ragged last tile (N=300, tn=128 -> 3 grid steps,
    # last block partially out of bounds; exercises masked boundary handling).
    N2 = 300
    x1b = jax.random.normal(k3, (N2, FIN), dtype=jnp.float32)
    x2b = x1b + 0.2 * jax.random.normal(k4, (N2, FIN), dtype=jnp.float32)
    out2 = weight_forward(x1b, x2b, w_t, tn=128)
    jax.block_until_ready(out2)
    ref2 = _reference(x1b, x2b, w, b)
    assert out2.shape == (N2,)
    assert jnp.allclose(out2, ref2, rtol=1e-4, atol=1e-6)

    print("KERNEL_OK")
</pallas_src>

<mosaic_0001>
module attributes {stable_mosaic.version = 11 : i64} {
  func.func @weight_kernel(%arg0: i32, %arg1: memref<8x32xf32, #tpu.memory_space<vmem>>, %arg2: memref<8x32xf32, #tpu.memory_space<vmem>>, %arg3: memref<32x32xf32, #tpu.memory_space<vmem>>, %arg4: memref<1x8xf32, #tpu.memory_space<vmem>>) attributes {dimension_semantics = [#tpu.dimension_semantics<parallel>], iteration_bounds = array<i64: 1>, scalar_prefetch = 0 : i64, scratch_operands = 0 : i64, tpu.core_type = #tpu.core_type<tc>, window_params = [{transform_indices = @transform_0, window_bounds = array<i64: 8, 32>}, {transform_indices = @transform_1, window_bounds = array<i64: 8, 32>}, {pipeline_mode = #tpu.pipeline_mode<synchronous>, transform_indices = @transform_2, window_bounds = array<i64: 32, 32>}, {transform_indices = @transform_3, window_bounds = array<i64: 1, 8>}]} {
    %c0 = arith.constant 0 : index
    %c0_0 = arith.constant 0 : index
    %0 = vector.load %arg1[%c0, %c0_0] : memref<8x32xf32, #tpu.memory_space<vmem>>, vector<8x32xf32>
    %c0_1 = arith.constant 0 : index
    %c0_2 = arith.constant 0 : index
    %1 = vector.load %arg2[%c0_1, %c0_2] : memref<8x32xf32, #tpu.memory_space<vmem>>, vector<8x32xf32>
    %2 = arith.subf %0, %1 : vector<8x32xf32>
    %c0_3 = arith.constant 0 : index
    %c0_4 = arith.constant 0 : index
    %3 = vector.load %arg3[%c0_3, %c0_4] : memref<32x32xf32, #tpu.memory_space<vmem>>, vector<32x32xf32>
    %cst = arith.constant dense<0.000000e+00> : vector<8x32xf32>
    %4 = tpu.matmul %2, %3, %cst {dimension_numbers = #tpu.dot_dimension_numbers<[1], [0], [0], [1], [0, 0, 1, 1], [], []>} : vector<8x32xf32>, vector<32x32xf32>, vector<8x32xf32> -> vector<8x32xf32>
    %5 = arith.mulf %4, %4 : vector<8x32xf32>
    %cst_5 = arith.constant dense<0.000000e+00> : vector<8xf32>
    %6 = vector.multi_reduction <add>, %5, %cst_5 [1] : vector<8x32xf32> to vector<8xf32>
    %7 = vector.shape_cast %6 : vector<8xf32> to vector<8x1xf32>
    %8 = tpu.transpose %7, [1, 0] : vector<8x1xf32> -> vector<1x8xf32>
    %cst_6 = arith.constant 0.000000e+00 : f32
    %9 = vector.broadcast %cst_6 : f32 to vector<1x8xf32>
    %10 = arith.subf %9, %8 : vector<1x8xf32>
    %11 = math.exp %10 : vector<1x8xf32>
    %cst_7 = arith.constant 9.99999971E-10 : f32
    %12 = vector.broadcast %cst_7 : f32 to vector<1x8xf32>
    %13 = arith.addf %11, %12 : vector<1x8xf32>
    %c0_8 = arith.constant 0 : index
    %c0_9 = arith.constant 0 : index
    %14 = vector.load %arg4[%c0_8, %c0_9] : memref<1x8xf32, #tpu.memory_space<vmem>>, vector<1x8xf32>
    tpu.vector_store %arg4[%c0_8, %c0_9], %13 {strides = array<i32>} : memref<1x8xf32, #tpu.memory_space<vmem>>, vector<1x8xf32>,
    return
  }
  func.func @transform_0(%arg0: i32) -> (i32, i32) {
    %c0_i32 = arith.constant 0 : i32
    %c0_i32_0 = arith.constant 0 : i32
    return %arg0, %c0_i32 : i32, i32
  }
  func.func @transform_1(%arg0: i32) -> (i32, i32) {
    %c0_i32 = arith.constant 0 : i32
    %c0_i32_0 = arith.constant 0 : i32
    return %arg0, %c0_i32 : i32, i32
  }
  func.func @transform_2(%arg0: i32) -> (i32, i32) {
    %c0_i32 = arith.constant 0 : i32
    %c0_i32_0 = arith.constant 0 : i32
    %c0_i32_1 = arith.constant 0 : i32
    return %c0_i32, %c0_i32_0 : i32, i32
  }
  func.func @transform_3(%arg0: i32) -> (i32, i32) {
    %c0_i32 = arith.constant 0 : i32
    %c0_i32_0 = arith.constant 0 : i32
    return %c0_i32, %arg0 : i32, i32
  }
}

</mosaic_0001>

<bundles_post_ra>
// kernel: tpu_custom_call.1
= control target key start
LH: loop header
LB: loop body
LE: loop exit
PB: predicated region body
PF: predicated region fallthrough
CT: control target
= control target key end

     0   :  { %8 = vsyncpa [#allocation3], 0  ;;  %s396_s0 = inlined_call_operand.hbm [shape: f32[8,32], index: 0, kind: input, shape index: {}]   ;;  %s397_s1 = inlined_call_operand.hbm [shape: f32[8,32], index: 1, kind: input, shape index: {}]   ;;  %s398_s2 = inlined_call_operand.hbm [shape: f32[32,32], index: 2, kind: input, shape index: {}]   ;;  %s399_s3 = inlined_call_operand.hbm [shape: f32[1,8], index: 3, kind: output, shape index: {}]  }
   0x1   :  { %9 = vsyncpa [#allocation6], 0 }
   0x2   :  { %10 = vsyncpa [#allocation4], 0  ;;  %s319_s12 = smov [#allocation5]   ;;  %s320_s14 = smov [#allocation2]  }
   0x3   :  { %s27_s13 = sshll.u32 %s319_s12, 4  ;;  %s17_s15 = sshll.u32 %s320_s14, 4  ;;  %s28_s13 = int_to_ptr.vmem [resolvable:$true] %s27_s13  ;;  %s18_s15 = int_to_ptr.vmem [resolvable:$true] %s17_s15 }
   0x4   :  { %s225_s18 = scalar_lea.hbm %s397_s1, 128 }
   0x5   :  { %p226_p0 = scmp.ne.s32.totalorder %s397_s1, %s225_s18  ;;  %p229_p1 = scmp.lt.u32.totalorder %s225_s18, %s397_s1 }
   0x7   :  { %p231_p2 = pnand %p229_p1, %p226_p0 }
   0x9   :  { %234 = shalt.err (!%p231_p2)
}
   0xa   :  { %s235_s23 = scalar_lea.vmem %s28_s13, 128  ;;  %p240_p4 = scmp.lt.s32.totalorder %s28_s13, %s28_s13 }
   0xb   :  { %p236_p3 = scmp.ne.s32.totalorder %s28_s13, %s235_s23  ;;  %p241_p5 = scmp.lt.s32.totalorder %s235_s23, %s235_s23 }
   0xd   :  { %p242_p6 = por %p241_p5, %p240_p4 }
   0xf   :  { %p243_p7 = pnand %p242_p6, %p236_p3 }
  0x11   :  { %246 = shalt.err (!%p243_p7)
}
  0x12   :  { %30 = dma.hbm_to_vmem [thread:$0]  %s397_s1, 128, %s28_s13, [#allocation6]  }
  0x13   :  { %s247_s28 = scalar_lea.hbm %s396_s0, 128 }
  0x14   :  { %p248_p8 = scmp.ne.s32.totalorder %s396_s0, %s247_s28  ;;  %p251_p9 = scmp.lt.u32.totalorder %s247_s28, %s396_s0 }
  0x16   :  { %p253_p10 = pnand %p251_p9, %p248_p8 }
  0x18   :  { %256 = shalt.err (!%p253_p10)
}
  0x19   :  { %s257_s6 = scalar_lea.vmem %s18_s15, 128  ;;  %p262_p12 = scmp.lt.s32.totalorder %s18_s15, %s18_s15 }
  0x1a   :  { %p258_p11 = scmp.ne.s32.totalorder %s18_s15, %s257_s6  ;;  %p263_p13 = scmp.lt.s32.totalorder %s257_s6, %s257_s6 }
  0x1c   :  { %p264_p0 = por %p263_p13, %p262_p12 }
  0x1e   :  { %p265_p1 = pnand %p264_p0, %p258_p11 }
  0x20   :  { %268 = shalt.err (!%p265_p1)
}
  0x21   :  { %20 = dma.hbm_to_vmem [thread:$0]  %s396_s0, 128, %s18_s15, [#allocation3]  }
  0x22   :  { %s321_s8 = smov [#allocation7]   ;;  %s269_s12 = scalar_lea.hbm %s398_s2, 512 }
  0x23   :  { %s36_s9 = sshll.u32 %s321_s8, 4  ;;  %p270_p2 = scmp.ne.s32.totalorder %s398_s2, %s269_s12  ;;  %s37_s9 = int_to_ptr.vmem [resolvable:$true] %s36_s9 }
  0x24   :  { %p273_p3 = scmp.lt.u32.totalorder %s269_s12, %s398_s2 }
  0x26   :  { %p275_p4 = pnand %p273_p3, %p270_p2 }
  0x28   :  { %278 = shalt.err (!%p275_p4)
}
  0x29   :  { %s279_s18 = scalar_lea.vmem %s37_s9, 512  ;;  %p284_p6 = scmp.lt.s32.totalorder %s37_s9, %s37_s9 }
  0x2a   :  { %p280_p5 = scmp.ne.s32.totalorder %s37_s9, %s279_s18  ;;  %p285_p7 = scmp.lt.s32.totalorder %s279_s18, %s279_s18 }
  0x2c   :  { %p286_p8 = por %p285_p7, %p284_p6 }
  0x2e   :  { %p287_p9 = pnand %p286_p8, %p280_p5 }
  0x30   :  { %290 = shalt.err (!%p287_p9)
}
  0x31   :  { %s322_s0 = smov 128   ;;  %s323_s15 = smov 8  }
  0x32   :  { %42 = dma.hbm_to_vmem [thread:$0]  %s398_s2, 512, %s37_s9, [#allocation6], %s322_s0, %s322_s0, %s323_s15  }
  0x33   :  { %313 = dma.done.wait [#allocation3], 128  }
  0x34   :  { %314 = vsyncadd [#allocation3], 4294967168 }
  0x35   :  { %315 = dma.done.wait [#allocation6], 640  }
  0x36   :  { %316 = vsyncadd [#allocation6], 4294966656  ;;  %v324_v0 = vmov 0.0|0.0   ;;  %vm325_vm0 = vmmov 0   ;;  %v326_v1 = vmov 0.0   ;;  %v55_v2 = vld [vmem:[#allocation7] sm:$0xff] }
  0x37   :  { %208 = vmatprep.subr.bf16.mxu0 %v324_v0  ;;  %205 = vmatprep.mubr.msk.f32.mxu0 %vm325_vm0, %v326_v1  ;;  %v56_v3 = vld [vmem:[#allocation7 + $0x8] sm:$0xff]  ;;  %v57_v4 = vld [vmem:[#allocation7 + $0x10] sm:$0xff]  ;;  %v58_v6 = vld [vmem:[#allocation7 + $0x18] sm:$0xff]  ;;  %vm59_vm1 = vcmask 261120   ;;  %s327_s2 = smov [#allocation8]   ;;  %vm173_vm2 = vcmask 57344  }
  0x38   :  { %v209_v5 = vpack.c.bf16 %v56_v3, %v55_v2  ;;  %v212_v7 = vpack.c.bf16 %v58_v6, %v57_v4  ;;  %v52_v8 = vld [vmem:[#allocation2] sm:$0xff]  ;;  %v53_v9 = vld [vmem:[#allocation5] sm:$0xff]  ;;  %s181_s21 = sshll.u32 %s327_s2, 4  ;;  %s182_s21 = int_to_ptr.vmem [resolvable:$true] %s181_s21 }
  0x39   :  { %v54_v10 = vsub.f32 %v52_v8, %v53_v9  ;;  %s291_s22 = scalar_lea.vmem %s182_s21, 16  ;;  %s295_s23 = scalar_lea.vmem %s182_s21, 32 }
  0x3a   :  { %210 = vmatpush3.bf16.msra.mxu0 %v209_v5  ;;  %p292_p10 = scmp.ne.s32.totalorder %s182_s21, %s291_s22  ;;  %p296_p11 = scmp.lt.s32.totalorder %s182_s21, %s182_s21 }
  0x3b   :  { %211 = vmatprep.subr.bf16.mxu0 %v324_v0  ;;  %p297_p12 = scmp.lt.s32.totalorder %s295_s23, %s291_s22 }
  0x3d   :  { %p298_p13 = por %p297_p12, %p296_p11 }
  0x3e   :  { %213 = vmatpush3.bf16.msra.mxu0 %v212_v7 }
  0x3f   :  { %p299_p0 = pnand %p298_p13, %p292_p10 }
  0x41   :  { %206 = vmatmul.mubr.msk.f32.vlgmr.msra.gmra.mrb[0].mxu0 %vm59_vm1, %v54_v10 }
 0x114   :  { %v129_v11 = vpop.f32.mrb[0].mxu0 }
 0x115   :  { %v133_v12 = vmul.f32 %v129_v11, %v129_v11  ;;  %v207_v13 = vpop.f32.mrb[1].mxu0 }
 0x117   :  { %v134_v14 = vsel %vm59_vm1, %v133_v12, 0.0 }
 0x118   :  { %135 = vadd.xlane.f32.xlu0 %v134_v14 }
 0x1a5   :  { %v136_v15 = vpop.xlane.xlu0 %135 }
 0x1a6   :  { %137 = vxpose.xlu0.b32.start.end [1/1] (short) (narrow) %v136_v15, 8 }
 0x226   :  { %v153_v16 = vpop.trf.xlu0 }
 0x227   :  { %v169_v17 = vsub.f32 0.0, %v153_v16 }
 0x229   :  { %v170_v18 = vmul.f32 1.442695, %v169_v17 }
 0x22b   :  { %223 = vpow2.f32 %v170_v18 }
 0x235   :  { %v224_v19 = vpop.eup %223 }
 0x236   :  { %v172_v20 = vadd.f32 1e-09, %v224_v19 }
 0x238   :  { %174 = vst.msk [vmem:[#allocation8] sm:$0x1] %vm173_vm2, %v172_v20 }
 0x239   :  { %302 = shalt.err (!%p299_p0)
}
 0x23a   :  { %s303_s26 = scalar_lea.hbm %s399_s3, 16 }
 0x23b   :  { %p304_p1 = scmp.ne.s32.totalorder %s399_s3, %s303_s26  ;;  %p307_p2 = scmp.lt.u32.totalorder %s303_s26, %s399_s3 }
 0x23d   :  { %p309_p3 = pnand %p307_p2, %p304_p1 }
 0x23f   :  { %312 = shalt.err (!%p309_p3)
}
 0x240   :  { %184 = dma.vmem_to_hbm [thread:$0]  %s182_s21, 16, %s399_s3, [#allocation4]  }
 0x241   :  { %317 = dma.done.wait [#allocation4], 16  }
 0x242   :  { %318 = vsyncadd [#allocation4], 4294967280 }
 0x243   :  { %188 = vsyncpa [#allocation3], 1 }
 0x244   :  { %189 = vsyncpa [#allocation6], 1 }
 0x245   :  { %190 = vsyncpa [#allocation4], 1 }

</bundles_post_ra>
